<compile_context>
chip_gen: v7x
topology: tpu7x:2x2x1
jax: 0.10.0
libtpu: 0.0.40
codegen_flags: <defaults>
</compile_context>

<pallas_src>
import jax
import jax.numpy as jnp
from jax import lax
from jax.experimental import pallas as pl
from jax.experimental.pallas import tpu as pltpu


def _lstm_kernel(x_ref, wih_ref, whh_ref, b_ref, wfc_ref, bfc_ref,
                 out_ref, xg_ref):
    """Whole-sequence LSTM + final Linear in one kernel invocation.

    x_ref:   (S*B, D_in)  time-major, flattened over (S, B)
    wih_ref: (D_in, 4H)   W_ih^T
    whh_ref: (H, 4H)      W_hh^T
    b_ref:   (1, 4H)      b_ih + b_hh
    wfc_ref: (H, O)       W_fc^T
    bfc_ref: (1, O)
    out_ref: (B, O)
    xg_ref:  (S*B, 4H)    scratch: precomputed input projections
    """
    SB, four_h = xg_ref.shape
    H = whh_ref.shape[0]
    B = out_ref.shape[0]
    S = SB // B

    # ---- Batched input projection for ALL timesteps (one big MXU matmul),
    # bias folded in once.  Only h @ W_hh stays inside the recurrence.
    xg_ref[...] = (
        jnp.dot(x_ref[...], wih_ref[...], preferred_element_type=jnp.float32)
        + b_ref[...]
    )

    # ---- Loop-invariant values, hoisted out of the recurrence.
    whh = whh_ref[...]
    lane = lax.broadcasted_iota(jnp.int32, (B, four_h), 1)
    is_tanh = (lane >= 2 * H) & (lane < 3 * H)       # g-gate lanes [2H, 3H)

    def step(t, carry):
        h, c = carry
        start = pl.multiple_of(t * B, B)
        gates = xg_ref[pl.ds(start, B), :] + jnp.dot(
            h, whh, preferred_element_type=jnp.float32)           # (B, 4H)
        # Full-vreg activations (EUP) + one lane-masked select instead of
        # four sub-128-lane activation slices.
        act = jnp.where(is_tanh, jnp.tanh(gates), jax.nn.sigmoid(gates))
        i_g = act[:, 0:H]
        f_g = act[:, H:2 * H]
        g_g = act[:, 2 * H:3 * H]
        o_g = act[:, 3 * H:4 * H]
        c_new = f_g * c + i_g * g_g
        h_new = o_g * jnp.tanh(c_new)
        return h_new, c_new

    h0 = jnp.zeros((B, H), jnp.float32)
    c0 = jnp.zeros((B, H), jnp.float32)
    h_last, _ = lax.fori_loop(0, S, step, (h0, c0), unroll=True)

    out_ref[...] = (
        jnp.dot(h_last, wfc_ref[...], preferred_element_type=jnp.float32)
        + bfc_ref[...]
    ).astype(out_ref.dtype)


def simple_lstm_forward(x, params):
    """x: (batch, seq, input_size). Returns (batch, output_size)."""
    w_ih_t, w_hh_t, b_gates, w_fc_t, b_fc = params
    B, S, D_in = x.shape
    H = w_hh_t.shape[0]
    O = w_fc_t.shape[1]

    # Time-major, flattened to (S*B, D_in) so the kernel can compute the
    # input projection for every timestep as a single MXU matmul.
    x_flat = jnp.transpose(x, (1, 0, 2)).reshape(S * B, D_in)

    return pl.pallas_call(
        _lstm_kernel,
        out_shape=jax.ShapeDtypeStruct((B, O), x.dtype),
        in_specs=[pl.BlockSpec(memory_space=pltpu.MemorySpace.VMEM)] * 6,
        out_specs=pl.BlockSpec(memory_space=pltpu.MemorySpace.VMEM),
        scratch_shapes=[pltpu.VMEM((S * B, 4 * H), jnp.float32)],
    )(x_flat, w_ih_t, w_hh_t, b_gates, w_fc_t, b_fc)


def init_params(key, input_size, hidden_size, output_size):
    """Deterministic parameter init (PyTorch-like uniform ranges)."""
    k1, k2, k3, k4, k5, k6 = jax.random.split(key, 6)
    s = 1.0 / jnp.sqrt(hidden_size)
    w_ih = jax.random.uniform(k1, (4 * hidden_size, input_size), jnp.float32, -s, s)
    w_hh = jax.random.uniform(k2, (4 * hidden_size, hidden_size), jnp.float32, -s, s)
    b_ih = jax.random.uniform(k3, (4 * hidden_size,), jnp.float32, -s, s)
    b_hh = jax.random.uniform(k4, (4 * hidden_size,), jnp.float32, -s, s)
    w_fc = jax.random.uniform(k5, (output_size, hidden_size), jnp.float32, -s, s)
    b_fc = jax.random.uniform(k6, (output_size,), jnp.float32, -s, s)
    return (w_ih.T, w_hh.T, (b_ih + b_hh)[None, :], w_fc.T, b_fc[None, :])


def reference_forward(x, params):
    """Pure-JAX reference matching nn.LSTM(batch_first) + Linear(last step)."""
    w_ih_t, w_hh_t, b_gates, w_fc_t, b_fc = params
    B, S, _ = x.shape
    H = w_hh_t.shape[0]
    h = jnp.zeros((B, H), jnp.float32)
    c = jnp.zeros((B, H), jnp.float32)
    for t in range(S):
        g = x[:, t, :] @ w_ih_t + h @ w_hh_t + b_gates
        i = jax.nn.sigmoid(g[:, 0:H])
        f = jax.nn.sigmoid(g[:, H:2 * H])
        gg = jnp.tanh(g[:, 2 * H:3 * H])
        o = jax.nn.sigmoid(g[:, 3 * H:4 * H])
        c = f * c + i * gg
        h = o * jnp.tanh(c)
    return h @ w_fc_t + b_fc


if __name__ == "__main__":
    batch, seq, input_size, hidden_size, output_size = 8, 8, 16, 32, 8

    key = jax.random.PRNGKey(0)
    kx, kp = jax.random.split(key)
    x = jax.random.normal(kx, (batch, seq, input_size), jnp.float32)
    params = init_params(kp, input_size, hidden_size, output_size)

    out = simple_lstm_forward(x, params)
    out = jax.block_until_ready(out)

    ref = reference_forward(x, params)
    assert out.shape == (batch, output_size)
    assert jnp.allclose(out, ref, atol=1e-5, rtol=1e-5)

    print("KERNEL_OK")
</pallas_src>

<mosaic_0001>
module attributes {stable_mosaic.version = 11 : i64} {
  func.func @_lstm_kernel(%arg0: memref<64x16xf32, #tpu.memory_space<vmem>>, %arg1: memref<16x128xf32, #tpu.memory_space<vmem>>, %arg2: memref<32x128xf32, #tpu.memory_space<vmem>>, %arg3: memref<1x128xf32, #tpu.memory_space<vmem>>, %arg4: memref<32x8xf32, #tpu.memory_space<vmem>>, %arg5: memref<1x8xf32, #tpu.memory_space<vmem>>, %arg6: memref<8x8xf32, #tpu.memory_space<vmem>>, %arg7: memref<64x128xf32, #tpu.memory_space<vmem>>) attributes {dimension_semantics = [], scalar_prefetch = 0 : i64, scratch_operands = 1 : i64, tpu.core_type = #tpu.core_type<tc>} {
    %c0 = arith.constant 0 : index
    %c0_0 = arith.constant 0 : index
    %0 = vector.load %arg0[%c0, %c0_0] : memref<64x16xf32, #tpu.memory_space<vmem>>, vector<64x16xf32>
    %c0_1 = arith.constant 0 : index
    %c0_2 = arith.constant 0 : index
    %1 = vector.load %arg1[%c0_1, %c0_2] : memref<16x128xf32, #tpu.memory_space<vmem>>, vector<16x128xf32>
    %cst = arith.constant dense<0.000000e+00> : vector<64x128xf32>
    %2 = tpu.matmul %0, %1, %cst {dimension_numbers = #tpu.dot_dimension_numbers<[1], [0], [0], [1], [0, 0, 1, 1], [], []>} : vector<64x16xf32>, vector<16x128xf32>, vector<64x128xf32> -> vector<64x128xf32>
    %c0_3 = arith.constant 0 : index
    %c0_4 = arith.constant 0 : index
    %3 = vector.load %arg3[%c0_3, %c0_4] : memref<1x128xf32, #tpu.memory_space<vmem>>, vector<1x128xf32>
    %4 = vector.broadcast %3 : vector<1x128xf32> to vector<64x128xf32>
    %5 = arith.addf %2, %4 : vector<64x128xf32>
    %c0_5 = arith.constant 0 : index
    %c0_6 = arith.constant 0 : index
    %6 = vector.load %arg7[%c0_5, %c0_6] : memref<64x128xf32, #tpu.memory_space<vmem>>, vector<64x128xf32>
    tpu.vector_store %arg7[%c0_5, %c0_6], %5 {strides = array<i32>} : memref<64x128xf32, #tpu.memory_space<vmem>>, vector<64x128xf32>,
    %c0_7 = arith.constant 0 : index
    %c0_8 = arith.constant 0 : index
    %7 = vector.load %arg2[%c0_7, %c0_8] : memref<32x128xf32, #tpu.memory_space<vmem>>, vector<32x128xf32>
    %8 = tpu.iota {dimensions = array<i32: 1>} : vector<8x128xi32>
    %c64_i32 = arith.constant 64 : i32
    %9 = vector.broadcast %c64_i32 : i32 to vector<8x128xi32>
    %10 = arith.cmpi sge, %8, %9 : vector<8x128xi32>
    %c96_i32 = arith.constant 96 : i32
    %11 = vector.broadcast %c96_i32 : i32 to vector<8x128xi32>
    %12 = arith.cmpi slt, %8, %11 : vector<8x128xi32>
    %13 = arith.andi %10, %12 : vector<8x128xi1>
    %cst_9 = arith.constant 0.000000e+00 : f32
    %14 = vector.broadcast %cst_9 : f32 to vector<8x32xf32>
    %cst_10 = arith.constant 0.000000e+00 : f32
    %15 = vector.broadcast %cst_10 : f32 to vector<8x32xf32>
    %c0_i32 = arith.constant 0 : i32
    %c8_i32 = arith.constant 8 : i32
    %16 = arith.muli %c0_i32, %c8_i32 : i32
    %17 = tpu.assume_multiple %16, 8 : i32
    %18 = arith.index_cast %17 : i32 to index
    %c0_11 = arith.constant 0 : index
    %19 = vector.load %arg7[%18, %c0_11] : memref<64x128xf32, #tpu.memory_space<vmem>>, vector<8x128xf32>
    %cst_12 = arith.constant dense<0.000000e+00> : vector<8x128xf32>
    %20 = tpu.matmul %14, %7, %cst_12 {dimension_numbers = #tpu.dot_dimension_numbers<[1], [0], [0], [1], [0, 0, 1, 1], [], []>} : vector<8x32xf32>, vector<32x128xf32>, vector<8x128xf32> -> vector<8x128xf32>
    %21 = arith.addf %19, %20 : vector<8x128xf32>
    %22 = math.tanh %21 : vector<8x128xf32>
    %23 = arith.negf %21 : vector<8x128xf32>
    %24 = math.exp %23 : vector<8x128xf32>
    %cst_13 = arith.constant 1.000000e+00 : f32
    %25 = vector.broadcast %cst_13 : f32 to vector<8x128xf32>
    %26 = arith.addf %25, %24 : vector<8x128xf32>
    %27 = arith.divf %25, %26 : vector<8x128xf32>
    %28 = arith.select %13, %22, %27 : vector<8x128xi1>, vector<8x128xf32>
    %29 = vector.extract_strided_slice %28 {offsets = [0, 0], sizes = [8, 32], strides = [1, 1]} : vector<8x128xf32> to vector<8x32xf32>
    %30 = vector.extract_strided_slice %28 {offsets = [0, 32], sizes = [8, 32], strides = [1, 1]} : vector<8x128xf32> to vector<8x32xf32>
    %31 = vector.extract_strided_slice %28 {offsets = [0, 64], sizes = [8, 32], strides = [1, 1]} : vector<8x128xf32> to vector<8x32xf32>
    %32 = vector.extract_strided_slice %28 {offsets = [0, 96], sizes = [8, 32], strides = [1, 1]} : vector<8x128xf32> to vector<8x32xf32>
    %33 = arith.mulf %30, %15 : vector<8x32xf32>
    %34 = arith.mulf %29, %31 : vector<8x32xf32>
    %35 = arith.addf %33, %34 : vector<8x32xf32>
    %36 = math.tanh %35 : vector<8x32xf32>
    %37 = arith.mulf %32, %36 : vector<8x32xf32>
    %c1_i32 = arith.constant 1 : i32
    %c8_i32_14 = arith.constant 8 : i32
    %38 = arith.muli %c1_i32, %c8_i32_14 : i32
    %39 = tpu.assume_multiple %38, 8 : i32
    %40 = arith.index_cast %39 : i32 to index
    %c0_15 = arith.constant 0 : index
    %41 = vector.load %arg7[%40, %c0_15] : memref<64x128xf32, #tpu.memory_space<vmem>>, vector<8x128xf32>
    %cst_16 = arith.constant dense<0.000000e+00> : vector<8x128xf32>
    %42 = tpu.matmul %37, %7, %cst_16 {dimension_numbers = #tpu.dot_dimension_numbers<[1], [0], [0], [1], [0, 0, 1, 1], [], []>} : vector<8x32xf32>, vector<32x128xf32>, vector<8x128xf32> -> vector<8x128xf32>
    %43 = arith.addf %41, %42 : vector<8x128xf32>
    %44 = math.tanh %43 : vector<8x128xf32>
    %45 = arith.negf %43 : vector<8x128xf32>
    %46 = math.exp %45 : vector<8x128xf32>
    %cst_17 = arith.constant 1.000000e+00 : f32
    %47 = vector.broadcast %cst_17 : f32 to vector<8x128xf32>
    %48 = arith.addf %47, %46 : vector<8x128xf32>
    %49 = arith.divf %47, %48 : vector<8x128xf32>
    %50 = arith.select %13, %44, %49 : vector<8x128xi1>, vector<8x128xf32>
    %51 = vector.extract_strided_slice %50 {offsets = [0, 0], sizes = [8, 32], strides = [1, 1]} : vector<8x128xf32> to vector<8x32xf32>
    %52 = vector.extract_strided_slice %50 {offsets = [0, 32], sizes = [8, 32], strides = [1, 1]} : vector<8x128xf32> to vector<8x32xf32>
    %53 = vector.extract_strided_slice %50 {offsets = [0, 64], sizes = [8, 32], strides = [1, 1]} : vector<8x128xf32> to vector<8x32xf32>
    %54 = vector.extract_strided_slice %50 {offsets = [0, 96], sizes = [8, 32], strides = [1, 1]} : vector<8x128xf32> to vector<8x32xf32>
    %55 = arith.mulf %52, %35 : vector<8x32xf32>
    %56 = arith.mulf %51, %53 : vector<8x32xf32>
    %57 = arith.addf %55, %56 : vector<8x32xf32>
    %58 = math.tanh %57 : vector<8x32xf32>
    %59 = arith.mulf %54, %58 : vector<8x32xf32>
    %c2_i32 = arith.constant 2 : i32
    %c8_i32_18 = arith.constant 8 : i32
    %60 = arith.muli %c2_i32, %c8_i32_18 : i32
    %61 = tpu.assume_multiple %60, 8 : i32
    %62 = arith.index_cast %61 : i32 to index
    %c0_19 = arith.constant 0 : index
    %63 = vector.load %arg7[%62, %c0_19] : memref<64x128xf32, #tpu.memory_space<vmem>>, vector<8x128xf32>
    %cst_20 = arith.constant dense<0.000000e+00> : vector<8x128xf32>
    %64 = tpu.matmul %59, %7, %cst_20 {dimension_numbers = #tpu.dot_dimension_numbers<[1], [0], [0], [1], [0, 0, 1, 1], [], []>} : vector<8x32xf32>, vector<32x128xf32>, vector<8x128xf32> -> vector<8x128xf32>
    %65 = arith.addf %63, %64 : vector<8x128xf32>
    %66 = math.tanh %65 : vector<8x128xf32>
    %67 = arith.negf %65 : vector<8x128xf32>
    %68 = math.exp %67 : vector<8x128xf32>
    %cst_21 = arith.constant 1.000000e+00 : f32
    %69 = vector.broadcast %cst_21 : f32 to vector<8x128xf32>
    %70 = arith.addf %69, %68 : vector<8x128xf32>
    %71 = arith.divf %69, %70 : vector<8x128xf32>
    %72 = arith.select %13, %66, %71 : vector<8x128xi1>, vector<8x128xf32>
    %73 = vector.extract_strided_slice %72 {offsets = [0, 0], sizes = [8, 32], strides = [1, 1]} : vector<8x128xf32> to vector<8x32xf32>
    %74 = vector.extract_strided_slice %72 {offsets = [0, 32], sizes = [8, 32], strides = [1, 1]} : vector<8x128xf32> to vector<8x32xf32>
    %75 = vector.extract_strided_slice %72 {offsets = [0, 64], sizes = [8, 32], strides = [1, 1]} : vector<8x128xf32> to vector<8x32xf32>
    %76 = vector.extract_strided_slice %72 {offsets = [0, 96], sizes = [8, 32], strides = [1, 1]} : vector<8x128xf32> to vector<8x32xf32>
    %77 = arith.mulf %74, %57 : vector<8x32xf32>
    %78 = arith.mulf %73, %75 : vector<8x32xf32>
    %79 = arith.addf %77, %78 : vector<8x32xf32>
    %80 = math.tanh %79 : vector<8x32xf32>
    %81 = arith.mulf %76, %80 : vector<8x32xf32>
    %c3_i32 = arith.constant 3 : i32
    %c8_i32_22 = arith.constant 8 : i32
    %82 = arith.muli %c3_i32, %c8_i32_22 : i32
    %83 = tpu.assume_multiple %82, 8 : i32
    %84 = arith.index_cast %83 : i32 to index
    %c0_23 = arith.constant 0 : index
    %85 = vector.load %arg7[%84, %c0_23] : memref<64x128xf32, #tpu.memory_space<vmem>>, vector<8x128xf32>
    %cst_24 = arith.constant dense<0.000000e+00> : vector<8x128xf32>
    %86 = tpu.matmul %81, %7, %cst_24 {dimension_numbers = #tpu.dot_dimension_numbers<[1], [0], [0], [1], [0, 0, 1, 1], [], []>} : vector<8x32xf32>, vector<32x128xf32>, vector<8x128xf32> -> vector<8x128xf32>
    %87 = arith.addf %85, %86 : vector<8x128xf32>
    %88 = math.tanh %87 : vector<8x128xf32>
    %89 = arith.negf %87 : vector<8x128xf32>
    %90 = math.exp %89 : vector<8x128xf32>
    %cst_25 = arith.constant 1.000000e+00 : f32
    %91 = vector.broadcast %cst_25 : f32 to vector<8x128xf32>
    %92 = arith.addf %91, %90 : vector<8x128xf32>
    %93 = arith.divf %91, %92 : vector<8x128xf32>
    %94 = arith.select %13, %88, %93 : vector<8x128xi1>, vector<8x128xf32>
    %95 = vector.extract_strided_slice %94 {offsets = [0, 0], sizes = [8, 32], strides = [1, 1]} : vector<8x128xf32> to vector<8x32xf32>
    %96 = vector.extract_strided_slice %94 {offsets = [0, 32], sizes = [8, 32], strides = [1, 1]} : vector<8x128xf32> to vector<8x32xf32>
    %97 = vector.extract_strided_slice %94 {offsets = [0, 64], sizes = [8, 32], strides = [1, 1]} : vector<8x128xf32> to vector<8x32xf32>
    %98 = vector.extract_strided_slice %94 {offsets = [0, 96], sizes = [8, 32], strides = [1, 1]} : vector<8x128xf32> to vector<8x32xf32>
    %99 = arith.mulf %96, %79 : vector<8x32xf32>
    %100 = arith.mulf %95, %97 : vector<8x32xf32>
    %101 = arith.addf %99, %100 : vector<8x32xf32>
    %102 = math.tanh %101 : vector<8x32xf32>
    %103 = arith.mulf %98, %102 : vector<8x32xf32>
    %c4_i32 = arith.constant 4 : i32
    %c8_i32_26 = arith.constant 8 : i32
    %104 = arith.muli %c4_i32, %c8_i32_26 : i32
    %105 = tpu.assume_multiple %104, 8 : i32
    %106 = arith.index_cast %105 : i32 to index
    %c0_27 = arith.constant 0 : index
    %107 = vector.load %arg7[%106, %c0_27] : memref<64x128xf32, #tpu.memory_space<vmem>>, vector<8x128xf32>
    %cst_28 = arith.constant dense<0.000000e+00> : vector<8x128xf32>
    %108 = tpu.matmul %103, %7, %cst_28 {dimension_numbers = #tpu.dot_dimension_numbers<[1], [0], [0], [1], [0, 0, 1, 1], [], []>} : vector<8x32xf32>, vector<32x128xf32>, vector<8x128xf32> -> vector<8x128xf32>
    %109 = arith.addf %107, %108 : vector<8x128xf32>
    %110 = math.tanh %109 : vector<8x128xf32>
    %111 = arith.negf %109 : vector<8x128xf32>
    %112 = math.exp %111 : vector<8x128xf32>
    %cst_29 = arith.constant 1.000000e+00 : f32
    %113 = vector.broadcast %cst_29 : f32 to vector<8x128xf32>
    %114 = arith.addf %113, %112 : vector<8x128xf32>
    %115 = arith.divf %113, %114 : vector<8x128xf32>
    %116 = arith.select %13, %110, %115 : vector<8x128xi1>, vector<8x128xf32>
    %117 = vector.extract_strided_slice %116 {offsets = [0, 0], sizes = [8, 32], strides = [1, 1]} : vector<8x128xf32> to vector<8x32xf32>
    %118 = vector.extract_strided_slice %116 {offsets = [0, 32], sizes = [8, 32], strides = [1, 1]} : vector<8x128xf32> to vector<8x32xf32>
    %119 = vector.extract_strided_slice %116 {offsets = [0, 64], sizes = [8, 32], strides = [1, 1]} : vector<8x128xf32> to vector<8x32xf32>
    %120 = vector.extract_strided_slice %116 {offsets = [0, 96], sizes = [8, 32], strides = [1, 1]} : vector<8x128xf32> to vector<8x32xf32>
    %121 = arith.mulf %118, %101 : vector<8x32xf32>
    %122 = arith.mulf %117, %119 : vector<8x32xf32>
    %123 = arith.addf %121, %122 : vector<8x32xf32>
    %124 = math.tanh %123 : vector<8x32xf32>
    %125 = arith.mulf %120, %124 : vector<8x32xf32>
    %c5_i32 = arith.constant 5 : i32
    %c8_i32_30 = arith.constant 8 : i32
    %126 = arith.muli %c5_i32, %c8_i32_30 : i32
    %127 = tpu.assume_multiple %126, 8 : i32
    %128 = arith.index_cast %127 : i32 to index
    %c0_31 = arith.constant 0 : index
    %129 = vector.load %arg7[%128, %c0_31] : memref<64x128xf32, #tpu.memory_space<vmem>>, vector<8x128xf32>
    %cst_32 = arith.constant dense<0.000000e+00> : vector<8x128xf32>
    %130 = tpu.matmul %125, %7, %cst_32 {dimension_numbers = #tpu.dot_dimension_numbers<[1], [0], [0], [1], [0, 0, 1, 1], [], []>} : vector<8x32xf32>, vector<32x128xf32>, vector<8x128xf32> -> vector<8x128xf32>
    %131 = arith.addf %129, %130 : vector<8x128xf32>
    %132 = math.tanh %131 : vector<8x128xf32>
    %133 = arith.negf %131 : vector<8x128xf32>
    %134 = math.exp %133 : vector<8x128xf32>
    %cst_33 = arith.constant 1.000000e+00 : f32
    %135 = vector.broadcast %cst_33 : f32 to vector<8x128xf32>
    %136 = arith.addf %135, %134 : vector<8x128xf32>
    %137 = arith.divf %135, %136 : vector<8x128xf32>
    %138 = arith.select %13, %132, %137 : vector<8x128xi1>, vector<8x128xf32>
    %139 = vector.extract_strided_slice %138 {offsets = [0, 0], sizes = [8, 32], strides = [1, 1]} : vector<8x128xf32> to vector<8x32xf32>
    %140 = vector.extract_strided_slice %138 {offsets = [0, 32], sizes = [8, 32], strides = [1, 1]} : vector<8x128xf32> to vector<8x32xf32>
    %141 = vector.extract_strided_slice %138 {offsets = [0, 64], sizes = [8, 32], strides = [1, 1]} : vector<8x128xf32> to vector<8x32xf32>
    %142 = vector.extract_strided_slice %138 {offsets = [0, 96], sizes = [8, 32], strides = [1, 1]} : vector<8x128xf32> to vector<8x32xf32>
    %143 = arith.mulf %140, %123 : vector<8x32xf32>
    %144 = arith.mulf %139, %141 : vector<8x32xf32>
    %145 = arith.addf %143, %144 : vector<8x32xf32>
    %146 = math.tanh %145 : vector<8x32xf32>
    %147 = arith.mulf %142, %146 : vector<8x32xf32>
    %c6_i32 = arith.constant 6 : i32
    %c8_i32_34 = arith.constant 8 : i32
    %148 = arith.muli %c6_i32, %c8_i32_34 : i32
    %149 = tpu.assume_multiple %148, 8 : i32
    %150 = arith.index_cast %149 : i32 to index
    %c0_35 = arith.constant 0 : index
    %151 = vector.load %arg7[%150, %c0_35] : memref<64x128xf32, #tpu.memory_space<vmem>>, vector<8x128xf32>
    %cst_36 = arith.constant dense<0.000000e+00> : vector<8x128xf32>
    %152 = tpu.matmul %147, %7, %cst_36 {dimension_numbers = #tpu.dot_dimension_numbers<[1], [0], [0], [1], [0, 0, 1, 1], [], []>} : vector<8x32xf32>, vector<32x128xf32>, vector<8x128xf32> -> vector<8x128xf32>
    %153 = arith.addf %151, %152 : vector<8x128xf32>
    %154 = math.tanh %153 : vector<8x128xf32>
    %155 = arith.negf %153 : vector<8x128xf32>
    %156 = math.exp %155 : vector<8x128xf32>
    %cst_37 = arith.constant 1.000000e+00 : f32
    %157 = vector.broadcast %cst_37 : f32 to vector<8x128xf32>
    %158 = arith.addf %157, %156 : vector<8x128xf32>
    %159 = arith.divf %157, %158 : vector<8x128xf32>
    %160 = arith.select %13, %154, %159 : vector<8x128xi1>, vector<8x128xf32>
    %161 = vector.extract_strided_slice %160 {offsets = [0, 0], sizes = [8, 32], strides = [1, 1]} : vector<8x128xf32> to vector<8x32xf32>
    %162 = vector.extract_strided_slice %160 {offsets = [0, 32], sizes = [8, 32], strides = [1, 1]} : vector<8x128xf32> to vector<8x32xf32>
    %163 = vector.extract_strided_slice %160 {offsets = [0, 64], sizes = [8, 32], strides = [1, 1]} : vector<8x128xf32> to vector<8x32xf32>
    %164 = vector.extract_strided_slice %160 {offsets = [0, 96], sizes = [8, 32], strides = [1, 1]} : vector<8x128xf32> to vector<8x32xf32>
    %165 = arith.mulf %162, %145 : vector<8x32xf32>
    %166 = arith.mulf %161, %163 : vector<8x32xf32>
    %167 = arith.addf %165, %166 : vector<8x32xf32>
    %168 = math.tanh %167 : vector<8x32xf32>
    %169 = arith.mulf %164, %168 : vector<8x32xf32>
    %c7_i32 = arith.constant 7 : i32
    %c8_i32_38 = arith.constant 8 : i32
    %170 = arith.muli %c7_i32, %c8_i32_38 : i32
    %171 = tpu.assume_multiple %170, 8 : i32
    %172 = arith.index_cast %171 : i32 to index
    %c0_39 = arith.constant 0 : index
    %173 = vector.load %arg7[%172, %c0_39] : memref<64x128xf32, #tpu.memory_space<vmem>>, vector<8x128xf32>
    %cst_40 = arith.constant dense<0.000000e+00> : vector<8x128xf32>
    %174 = tpu.matmul %169, %7, %cst_40 {dimension_numbers = #tpu.dot_dimension_numbers<[1], [0], [0], [1], [0, 0, 1, 1], [], []>} : vector<8x32xf32>, vector<32x128xf32>, vector<8x128xf32> -> vector<8x128xf32>
    %175 = arith.addf %173, %174 : vector<8x128xf32>
    %176 = math.tanh %175 : vector<8x128xf32>
    %177 = arith.negf %175 : vector<8x128xf32>
    %178 = math.exp %177 : vector<8x128xf32>
    %cst_41 = arith.constant 1.000000e+00 : f32
    %179 = vector.broadcast %cst_41 : f32 to vector<8x128xf32>
    %180 = arith.addf %179, %178 : vector<8x128xf32>
    %181 = arith.divf %179, %180 : vector<8x128xf32>
    %182 = arith.select %13, %176, %181 : vector<8x128xi1>, vector<8x128xf32>
    %183 = vector.extract_strided_slice %182 {offsets = [0, 0], sizes = [8, 32], strides = [1, 1]} : vector<8x128xf32> to vector<8x32xf32>
    %184 = vector.extract_strided_slice %182 {offsets = [0, 32], sizes = [8, 32], strides = [1, 1]} : vector<8x128xf32> to vector<8x32xf32>
    %185 = vector.extract_strided_slice %182 {offsets = [0, 64], sizes = [8, 32], strides = [1, 1]} : vector<8x128xf32> to vector<8x32xf32>
    %186 = vector.extract_strided_slice %182 {offsets = [0, 96], sizes = [8, 32], strides = [1, 1]} : vector<8x128xf32> to vector<8x32xf32>
    %187 = arith.mulf %184, %167 : vector<8x32xf32>
    %188 = arith.mulf %183, %185 : vector<8x32xf32>
    %189 = arith.addf %187, %188 : vector<8x32xf32>
    %190 = math.tanh %189 : vector<8x32xf32>
    %191 = arith.mulf %186, %190 : vector<8x32xf32>
    %c8_i32_42 = arith.constant 8 : i32
    %c0_43 = arith.constant 0 : index
    %c0_44 = arith.constant 0 : index
    %192 = vector.load %arg4[%c0_43, %c0_44] : memref<32x8xf32, #tpu.memory_space<vmem>>, vector<32x8xf32>
    %cst_45 = arith.constant dense<0.000000e+00> : vector<8x8xf32>
    %193 = tpu.matmul %191, %192, %cst_45 {dimension_numbers = #tpu.dot_dimension_numbers<[1], [0], [0], [1], [0, 0, 1, 1], [], []>} : vector<8x32xf32>, vector<32x8xf32>, vector<8x8xf32> -> vector<8x8xf32>
    %c0_46 = arith.constant 0 : index
    %c0_47 = arith.constant 0 : index
    %194 = vector.load %arg5[%c0_46, %c0_47] : memref<1x8xf32, #tpu.memory_space<vmem>>, vector<1x8xf32>
    %195 = vector.broadcast %194 : vector<1x8xf32> to vector<8x8xf32>
    %196 = arith.addf %193, %195 : vector<8x8xf32>
    %c0_48 = arith.constant 0 : index
    %c0_49 = arith.constant 0 : index
    %197 = vector.load %arg6[%c0_48, %c0_49] : memref<8x8xf32, #tpu.memory_space<vmem>>, vector<8x8xf32>
    tpu.vector_store %arg6[%c0_48, %c0_49], %196 {strides = array<i32>} : memref<8x8xf32, #tpu.memory_space<vmem>>, vector<8x8xf32>,
    return
  }
}

</mosaic_0001>

<bundles_post_ra>
// kernel: tpu_custom_call.1
= control target key start
LH: loop header
LB: loop body
LE: loop exit
PB: predicated region body
PF: predicated region fallthrough
CT: control target
= control target key end

     0   :  { %vm41_vm0 = vcmask 130048   ;;  %v1460_v3 = vmov 0.0|0.0   ;;  %vm1461_vm1 = vmmov 0   ;;  %v1462_v10 = vmov 0.0   ;;  %s1720_s0 = inlined_call_operand.vmem [shape: f32[64,16], index: 0, kind: input, shape index: {}]   ;;  %s1721_s1 = inlined_call_operand.vmem [shape: f32[16,128], index: 1, kind: input, shape index: {}]   ;;  %s1722_s2 = inlined_call_operand.vmem [shape: f32[32,128], index: 2, kind: input, shape index: {}]   ;;  %s1723_s3 = inlined_call_operand.vmem [shape: f32[1,128], index: 3, kind: input, shape index: {}]   ;;  %s1724_s4 = inlined_call_operand.vmem [shape: f32[32,8], index: 4, kind: input, shape index: {}]   ;;  %s1725_s5 = inlined_call_operand.vmem [shape: f32[1,8], index: 5, kind: input, shape index: {}]   ;;  %s1726_s6 = inlined_call_operand.hbm [shape: f32[8,8], index: 6, kind: output, shape index: {}]  }
   0x1   :  { %v32_v0 = vld [vmem:[%s1721_s1] sm:$0xff]  ;;  %v33_v1 = vld [vmem:[%s1721_s1 + $0x8] sm:$0xff]  ;;  %1312 = vmatprep.subr.bf16.mxu1 %v1460_v3  ;;  %v181_v8 = vld [vmem:[%s1722_s2 + $0x10] sm:$0xff]  ;;  %1217 = vmatprep.mubr.msk.f32.mxu1 %vm1461_vm1, %v1462_v10 }
   0x2   :  { %v179_v2 = vld [vmem:[%s1722_s2] sm:$0xff]  ;;  %v1308_v4 = vpack.c.bf16 %v33_v1, %v32_v0  ;;  %v180_v5 = vld [vmem:[%s1722_s2 + $0x8] sm:$0xff]  ;;  %v182_v9 = vld [vmem:[%s1722_s2 + $0x18] sm:$0xff] }
   0x3   :  { %v24_v6 = vld [vmem:[%s1720_s0] sm:$0xff]  ;;  %v1517_v7 = vpack.c.bf16 %v180_v5, %v179_v2 }
   0x4   :  { %1197 = vmatprep.mubr.msk.f32.mxu0 %vm41_vm0, %v24_v6 }
   0x5   :  { %11 = vsyncpa [#allocation4], 0  ;;  %1309 = vmatprep.subr.bf16.mxu0 %v1308_v4  ;;  %1314 = vmatpush3.bf16.msra.mxu1 %v1517_v7  ;;  %v25_v11 = vld [vmem:[%s1720_s0 + $0x8] sm:$0xff]  ;;  %v1532_v12 = vpack.c.bf16 %v182_v9, %v181_v8  ;;  %v1553_v13 = vld [vmem:[%s1723_s3] ss:$0 sm:$0xff]  ;;  %v183_v22 = vlaneseq  ;;  %s1463_s3 = smov 64  }
   0x6   :  { %1311 = vmatpush3.bf16.msra.mxu0 %v1308_v4  ;;  %1315 = vmatprep.subr.bf16.mxu1 %v1460_v3  ;;  %s1464_s13 = smov 32   ;;  %vm189_vm5 = vcmask 261120   ;;  %v26_v53 = vld [vmem:[%s1720_s0 + $0x10] sm:$0xff]  ;;  %v27_v54 = vld [vmem:[%s1720_s0 + $0x18] sm:$0xff]  ;;  %v28_v55 = vld [vmem:[%s1720_s0 + $0x20] sm:$0xff]  ;;  %vm1096_vm6 = vcmask 64512  }
   0x7   :  { %1324 = vmatprep.subr.bf16.mxu0 %v1460_v3  ;;  %v184_v24 = vand.u32 127, %v183_v22  ;;  %v29_v56 = vld [vmem:[%s1720_s0 + $0x28] sm:$0xff]  ;;  %v30_v57 = vld [vmem:[%s1720_s0 + $0x30] sm:$0xff]  ;;  %v31_v58 = vld [vmem:[%s1720_s0 + $0x38] sm:$0xff] }
   0x8   :  { %v1012_v25 = vld [vmem:[%s1724_s4 + $0x10] sm:$0xff] }
   0x9   :  { %1198 = vmatmul.mubr.msk.f32.vlgmr.msra.gmra.mrb[0].mxu0 %vm41_vm0, %v25_v11  ;;  %1317 = vmatpush3.bf16.msra.mxu1 %v1532_v12  ;;  %vm185_vm2 = vcmp.ge.s32.totalorder %v184_v24, 64  ;;  %vm186_vm3 = vcmp.lt.s32.totalorder %v184_v24, 96 }
   0xa   :  { %1326 = vmatpush3.bf16.msra.mxu0 %v1517_v7  ;;  %1318 = vmatprep.subr.bf16.mxu1 %v1460_v3  ;;  %vm1556_vm4 = vmand %vm185_vm2, %vm186_vm3 }
   0xb   :  { %1327 = vmatprep.subr.bf16.mxu0 %v1460_v3  ;;  %1200 = vmatprep.mubr.msk.f32.mxu0 %vm41_vm0, %v26_v53 }
   0xc   :  { %1218 = vmatmul.mubr.f32.vlgmr.msra.gmra.mrb[0].mxu1 %v1462_v10 }
   0xd   :  { %1320 = vmatpush3.bf16.msra.mxu1 %v1517_v7  ;;  %1228 = vmatprep.mubr.msk.f32.mxu1 %vm1461_vm1, %v1462_v10 }
   0xe   :  { %1321 = vmatprep.subr.bf16.mxu1 %v1460_v3  ;;  %1329 = vmatpush3.bf16.msra.mxu0 %v1532_v12 }
   0xf   :  { %1336 = vmatprep.subr.bf16.mxu0 %v1460_v3  ;;  %1201 = vmatmul.mubr.msk.f32.gmra.mrb[2].mxu0 %vm41_vm0, %v27_v54 }
  0x10   :  { %1203 = vmatprep.mubr.msk.f32.mxu0 %vm41_vm0, %v28_v55 }
  0x11   :  { %1323 = vmatpush3.bf16.msra.mxu1 %v1532_v12 }
  0x12   :  { %1330 = vmatprep.subr.bf16.mxu1 %v1460_v3 }
  0x13   :  { %1204 = vmatmul.mubr.msk.f32.gmra.mrb[4].mxu0 %vm41_vm0, %v29_v56 }
  0x14   :  { %1206 = vmatprep.mubr.msk.f32.mxu0 %vm41_vm0, %v30_v57 }
  0x17   :  { %1207 = vmatmul.mubr.msk.f32.gmra.mrb[6].mxu0 %vm41_vm0, %v31_v58 }
  0x18   :  { %1239 = vmatprep.mubr.msk.f32.mxu0 %vm1461_vm1, %v1462_v10 }
  0xdc   :  { %v1199_v14 = vpop.f32.mrb[0].mxu0 }
  0xdd   :  { %v132_v15 = vpop.f32.mrb[1].mxu0  ;;  %v138_v38 = vadd.f32 %v1199_v14, %v1553_v13 }
  0xde   :  { %v133_v16 = vadd.f32 %v1553_v13, %v132_v15 }
  0xdf   :  { %v259_v17 = vpop.f32.mrb[0].mxu1 }
  0xe0   :  { %v263_v18 = vadd.f32 %v259_v17, %v133_v16  ;;  %v1219_v19 = vpop.f32.mrb[1].mxu1 }
  0xe2   :  { %v1121_v20 = vmul.f32 -1.442695, %v263_v18  ;;  %v1202_v62 = vpop.f32.mrb[2].mxu0 }
  0xe3   :  { %v142_v63 = vpop.f32.mrb[3].mxu0 }
  0xe4   :  { %1372 = vpow2.f32 %v1121_v20  ;;  %v143_v6 = vadd.f32 %v1553_v13, %v142_v63 }
  0xe5   :  { %1374 = vtanh.f32 %v263_v18 }
  0xe6   :  { %v1606_v0 = vpop.f32.mrb[4].mxu0 }
  0xe7   :  { %v1608_v1 = vpop.f32.mrb[5].mxu0 }
  0xea   :  { %v1610_v2 = vpop.f32.mrb[6].mxu0 }
  0xeb   :  { %v1612_v4 = vpop.f32.mrb[7].mxu0 }
  0xee   :  { %v1373_v21 = vpop.eup %1372 }
  0xef   :  { %v268_v23 = vadd.f32 1.0, %v1373_v21  ;;  %v1375_v26 = vpop.eup %1374 }
  0xf1   :  { %1376 = vrcp.f32 %v268_v23 }
  0xfb   :  { %v1377_v27 = vpop.eup %1376 }
  0xfc   :  { %v271_v28 = vsel %vm1556_vm4, %v1375_v26, %v1377_v27 }
  0xfd   :  { %274 = vrot.lane.b32.xlu0 %v271_v28, %s1463_s3  ;;  %v272_v31 = vmul.f32 0.0, %v271_v28 }
 0x16f   :  { %v275_v29 = vpop.permute.xlu0 %274 }
 0x170   :  { %v277_v30 = vmul.f32 %v275_v29, %v271_v28 }
 0x172   :  { %279 = vrot.lane.b32.xlu0 %v277_v30, %s1464_s13  ;;  %v148_v30 = vadd.f32 %v1202_v62, %v1553_v13 }
 0x1e4   :  { %v280_v32 = vpop.permute.xlu0 %279 }
 0x1e5   :  { %v282_v33 = vadd.f32 %v280_v32, %v272_v31 }
 0x1e7   :  { %1378 = vtanh.f32 %v282_v33 }
 0x1f1   :  { %v1379_v34 = vpop.eup %1378 }
 0x1f2   :  { %285 = vrot.lane.b32.xlu1 %v1379_v34, %s1463_s3 }
 0x264   :  { %v286_v35 = vpop.permute.xlu1 %285 }
 0x265   :  { %v288_v36 = vmul.f32 %v286_v35, %v271_v28 }
 0x267   :  { %292 = vrot.lane.b32.xlu1 %v288_v36, %s1464_s13 }
 0x2d9   :  { %v293_v37 = vpop.permute.xlu1 %292 }
 0x2da   :  { %1229 = vmatmul.mubr.msk.f32.vlgmr.msra.gmra.mrb[2].mxu1 %vm189_vm5, %v293_v37 }
 0x2db   :  { %1332 = vmatpush3.bf16.msra.mxu1 %v1517_v7  ;;  %1250 = vmatprep.mubr.msk.f32.mxu1 %vm1461_vm1, %v1462_v10 }
 0x2dc   :  { %1333 = vmatprep.subr.bf16.mxu1 %v1460_v3 }
 0x2df   :  { %1335 = vmatpush3.bf16.msra.mxu1 %v1532_v12 }
 0x2e0   :  { %1342 = vmatprep.subr.bf16.mxu1 %v1460_v3 }
 0x3ad   :  { %v362_v39 = vpop.f32.mrb[2].mxu1 }
 0x3ae   :  { %v366_v40 = vadd.f32 %v362_v39, %v138_v38  ;;  %v1230_v41 = vpop.f32.mrb[3].mxu1 }
 0x3b0   :  { %v1123_v42 = vmul.f32 -1.442695, %v366_v40 }
 0x3b2   :  { %1380 = vpow2.f32 %v1123_v42 }
 0x3b3   :  { %1382 = vtanh.f32 %v366_v40 }
 0x3bc   :  { %v1381_v43 = vpop.eup %1380 }
 0x3bd   :  { %v371_v44 = vadd.f32 1.0, %v1381_v43  ;;  %v1383_v45 = vpop.eup %1382 }
 0x3bf   :  { %1384 = vrcp.f32 %v371_v44 }
 0x3c9   :  { %v1385_v46 = vpop.eup %1384 }
 0x3ca   :  { %v374_v47 = vsel %vm1556_vm4, %v1383_v45, %v1385_v46 }
 0x3cb   :  { %377 = vrot.lane.b32.xlu0 %v374_v47, %s1463_s3  ;;  %v375_v50 = vmul.f32 %v374_v47, %v282_v33 }
 0x43d   :  { %v378_v48 = vpop.permute.xlu0 %377 }
 0x43e   :  { %v380_v49 = vmul.f32 %v378_v48, %v374_v47 }
 0x440   :  { %382 = vrot.lane.b32.xlu1 %v380_v49, %s1464_s13  ;;  %v153_v49 = vadd.f32 %v1553_v13, %v1608_v1 }
 0x4b2   :  { %v383_v51 = vpop.permute.xlu1 %382 }
 0x4b3   :  { %v385_v52 = vadd.f32 %v383_v51, %v375_v50 }
 0x4b5   :  { %1386 = vtanh.f32 %v385_v52 }
 0x4bf   :  { %v1387_v59 = vpop.eup %1386 }
 0x4c0   :  { %388 = vrot.lane.b32.xlu0 %v1387_v59, %s1463_s3 }
 0x532   :  { %v389_v60 = vpop.permute.xlu0 %388 }
 0x533   :  { %v391_v61 = vmul.f32 %v389_v60, %v374_v47 }
 0x535   :  { %395 = vrot.lane.b32.xlu1 %v391_v61, %s1464_s13 }
 0x5a7   :  { %v396_v5 = vpop.permute.xlu1 %395 }
 0x5a8   :  { %1240 = vmatmul.mubr.msk.f32.vlgmr.msra.gmra.mrb[8].mxu0 %vm189_vm5, %v396_v5 }
 0x5a9   :  { %1338 = vmatpush3.bf16.msra.mxu0 %v1517_v7  ;;  %1261 = vmatprep.mubr.msk.f32.mxu0 %vm1461_vm1, %v1462_v10 }
 0x5aa   :  { %1339 = vmatprep.subr.bf16.mxu0 %v1460_v3 }
 0x5ad   :  { %1341 = vmatpush3.bf16.msra.mxu0 %v1532_v12 }
 0x5ae   :  { %1348 = vmatprep.subr.bf16.mxu0 %v1460_v3 }
 0x67b   :  { %v465_v8 = vpop.f32.mrb[8].mxu0 }
 0x67c   :  { %v469_v9 = vadd.f32 %v465_v8, %v143_v6  ;;  %v1241_v11 = vpop.f32.mrb[9].mxu0 }
 0x67e   :  { %v1125_v14 = vmul.f32 -1.442695, %v469_v9 }
 0x680   :  { %1388 = vpow2.f32 %v1125_v14 }
 0x681   :  { %1390 = vtanh.f32 %v469_v9  ;;  %v158_v9 = vadd.f32 %v1606_v0, %v1553_v13 }
 0x68a   :  { %v1389_v15 = vpop.eup %1388 }
 0x68b   :  { %v474_v16 = vadd.f32 1.0, %v1389_v15  ;;  %v1391_v17 = vpop.eup %1390 }
 0x68d   :  { %1392 = vrcp.f32 %v474_v16 }
 0x697   :  { %v1393_v18 = vpop.eup %1392 }
 0x698   :  { %v477_v19 = vsel %vm1556_vm4, %v1391_v17, %v1393_v18 }
 0x699   :  { %480 = vrot.lane.b32.xlu0 %v477_v19, %s1463_s3  ;;  %v478_v22 = vmul.f32 %v477_v19, %v385_v52 }
 0x70b   :  { %v481_v20 = vpop.permute.xlu0 %480 }
 0x70c   :  { %v483_v21 = vmul.f32 %v481_v20, %v477_v19 }
 0x70e   :  { %485 = vrot.lane.b32.xlu1 %v483_v21, %s1464_s13 }
 0x780   :  { %v486_v23 = vpop.permute.xlu1 %485 }
 0x781   :  { %v488_v24 = vadd.f32 %v486_v23, %v478_v22 }
 0x783   :  { %1394 = vtanh.f32 %v488_v24 }
 0x78d   :  { %v1395_v26 = vpop.eup %1394 }
 0x78e   :  { %491 = vrot.lane.b32.xlu0 %v1395_v26, %s1463_s3 }
 0x800   :  { %v492_v27 = vpop.permute.xlu0 %491 }
 0x801   :  { %v494_v28 = vmul.f32 %v492_v27, %v477_v19 }
 0x803   :  { %498 = vrot.lane.b32.xlu1 %v494_v28, %s1464_s13 }
 0x875   :  { %v499_v29 = vpop.permute.xlu1 %498 }
 0x876   :  { %1251 = vmatmul.mubr.msk.f32.vlgmr.msra.gmra.mrb[4].mxu1 %vm189_vm5, %v499_v29  ;;  %v163_v29 = vadd.f32 %v1553_v13, %v1612_v4 }
 0x877   :  { %1344 = vmatpush3.bf16.msra.mxu1 %v1517_v7  ;;  %1272 = vmatprep.mubr.msk.f32.mxu1 %vm1461_vm1, %v1462_v10 }
 0x878   :  { %1345 = vmatprep.subr.bf16.mxu1 %v1460_v3 }
 0x87b   :  { %1347 = vmatpush3.bf16.msra.mxu1 %v1532_v12 }
 0x87c   :  { %1354 = vmatprep.subr.bf16.mxu1 %v1460_v3 }
 0x949   :  { %v568_v31 = vpop.f32.mrb[4].mxu1 }
 0x94a   :  { %v572_v32 = vadd.f32 %v568_v31, %v148_v30  ;;  %v1252_v33 = vpop.f32.mrb[5].mxu1 }
 0x94c   :  { %v1127_v34 = vmul.f32 -1.442695, %v572_v32 }
 0x94e   :  { %1396 = vpow2.f32 %v1127_v34 }
 0x94f   :  { %1398 = vtanh.f32 %v572_v32 }
 0x958   :  { %v1397_v35 = vpop.eup %1396 }
 0x959   :  { %v577_v36 = vadd.f32 1.0, %v1397_v35  ;;  %v1399_v37 = vpop.eup %1398 }
 0x95b   :  { %1400 = vrcp.f32 %v577_v36 }
 0x965   :  { %v1401_v38 = vpop.eup %1400 }
 0x966   :  { %v580_v39 = vsel %vm1556_vm4, %v1399_v37, %v1401_v38 }
 0x967   :  { %583 = vrot.lane.b32.xlu0 %v580_v39, %s1463_s3  ;;  %v581_v42 = vmul.f32 %v580_v39, %v488_v24 }
 0x9d9   :  { %v584_v40 = vpop.permute.xlu0 %583 }
 0x9da   :  { %v586_v41 = vmul.f32 %v584_v40, %v580_v39 }
 0x9dc   :  { %588 = vrot.lane.b32.xlu1 %v586_v41, %s1464_s13 }
 0xa4e   :  { %v589_v43 = vpop.permute.xlu1 %588 }
 0xa4f   :  { %v591_v44 = vadd.f32 %v589_v43, %v581_v42 }
 0xa51   :  { %1402 = vtanh.f32 %v591_v44 }
 0xa5b   :  { %v1403_v45 = vpop.eup %1402 }
 0xa5c   :  { %594 = vrot.lane.b32.xlu0 %v1403_v45, %s1463_s3 }
 0xace   :  { %v595_v46 = vpop.permute.xlu0 %594 }
 0xacf   :  { %v597_v47 = vmul.f32 %v595_v46, %v580_v39  ;;  %v168_v46 = vadd.f32 %v1610_v2, %v1553_v13 }
 0xad1   :  { %601 = vrot.lane.b32.xlu1 %v597_v47, %s1464_s13 }
 0xb43   :  { %v602_v48 = vpop.permute.xlu1 %601 }
 0xb44   :  { %1262 = vmatmul.mubr.msk.f32.vlgmr.msra.gmra.mrb[10].mxu0 %vm189_vm5, %v602_v48 }
 0xb45   :  { %1350 = vmatpush3.bf16.msra.mxu0 %v1517_v7  ;;  %1283 = vmatprep.mubr.msk.f32.mxu0 %vm1461_vm1, %v1462_v10 }
 0xb46   :  { %1351 = vmatprep.subr.bf16.mxu0 %v1460_v3 }
 0xb49   :  { %1353 = vmatpush3.bf16.msra.mxu0 %v1532_v12 }
 0xb4a   :  { %1360 = vmatprep.subr.bf16.mxu0 %v1460_v3 }
 0xc17   :  { %v671_v50 = vpop.f32.mrb[10].mxu0 }
 0xc18   :  { %v675_v51 = vadd.f32 %v671_v50, %v153_v49  ;;  %v1263_v52 = vpop.f32.mrb[11].mxu0 }
 0xc1a   :  { %v1129_v53 = vmul.f32 -1.442695, %v675_v51 }
 0xc1c   :  { %1404 = vpow2.f32 %v1129_v53 }
 0xc1d   :  { %1406 = vtanh.f32 %v675_v51 }
 0xc26   :  { %v1405_v54 = vpop.eup %1404 }
 0xc27   :  { %v680_v55 = vadd.f32 1.0, %v1405_v54  ;;  %v1407_v56 = vpop.eup %1406 }
 0xc29   :  { %1408 = vrcp.f32 %v680_v55 }
 0xc33   :  { %v1409_v57 = vpop.eup %1408 }
 0xc34   :  { %v683_v58 = vsel %vm1556_vm4, %v1407_v56, %v1409_v57 }
 0xc35   :  { %686 = vrot.lane.b32.xlu0 %v683_v58, %s1463_s3  ;;  %v684_v61 = vmul.f32 %v683_v58, %v591_v44 }
 0xca7   :  { %v687_v59 = vpop.permute.xlu0 %686 }
 0xca8   :  { %v689_v60 = vmul.f32 %v687_v59, %v683_v58  ;;  %v1010_v59 = vld [vmem:[%s1724_s4] sm:$0xff] }
 0xcaa   :  { %691 = vrot.lane.b32.xlu1 %v689_v60, %s1464_s13  ;;  %v1011_v60 = vld [vmem:[%s1724_s4 + $0x8] sm:$0xff] }
 0xd1c   :  { %v692_v62 = vpop.permute.xlu1 %691 }
 0xd1d   :  { %v694_v63 = vadd.f32 %v692_v62, %v684_v61  ;;  %v1361_v61 = vpack.c.bf16 %v1011_v60, %v1010_v59  ;;  %v1013_v62 = vld [vmem:[%s1724_s4 + $0x18] sm:$0xff]  ;;  %s1465_s4 = smov [#allocation3]  }
 0xd1e   :  { %s1104_s10 = sshll.u32 %s1465_s4, 4  ;;  %s1105_s10 = int_to_ptr.vmem [resolvable:$true] %s1104_s10 }
 0xd1f   :  { %1410 = vtanh.f32 %v694_v63  ;;  %s1436_s11 = scalar_lea.vmem %s1105_s10, 128  ;;  %p1441_p1 = scmp.lt.s32.totalorder %s1105_s10, %s1105_s10 }
 0xd20   :  { %p1437_p0 = scmp.ne.s32.totalorder %s1105_s10, %s1436_s11  ;;  %p1442_p2 = scmp.lt.s32.totalorder %s1436_s11, %s1436_s11 }
 0xd22   :  { %p1443_p3 = por %p1442_p2, %p1441_p1 }
 0xd24   :  { %p1444_p4 = pnand %p1443_p3, %p1437_p0 }
 0xd29   :  { %v1411_v1 = vpop.eup %1410 }
 0xd2a   :  { %697 = vrot.lane.b32.xlu0 %v1411_v1, %s1463_s3 }
 0xd9c   :  { %v698_v5 = vpop.permute.xlu0 %697 }
 0xd9d   :  { %v700_v6 = vmul.f32 %v698_v5, %v683_v58 }
 0xd9f   :  { %704 = vrot.lane.b32.xlu1 %v700_v6, %s1464_s13 }
 0xe11   :  { %v705_v8 = vpop.permute.xlu1 %704 }
 0xe12   :  { %1273 = vmatmul.mubr.msk.f32.vlgmr.msra.gmra.mrb[6].mxu1 %vm189_vm5, %v705_v8 }
 0xe13   :  { %1356 = vmatpush3.bf16.msra.mxu1 %v1517_v7  ;;  %1294 = vmatprep.mubr.msk.f32.mxu1 %vm1461_vm1, %v1462_v10 }
 0xe14   :  { %1357 = vmatprep.subr.bf16.mxu1 %v1460_v3 }
 0xe17   :  { %1359 = vmatpush3.bf16.msra.mxu1 %v1532_v12 }
 0xee5   :  { %v774_v11 = vpop.f32.mrb[6].mxu1 }
 0xee6   :  { %v778_v14 = vadd.f32 %v774_v11, %v158_v9  ;;  %v1274_v15 = vpop.f32.mrb[7].mxu1  ;;  %v1136_v9 = vld [vmem:[%s1725_s5] ss:$0 sm:$0xff] }
 0xee8   :  { %v1131_v16 = vmul.f32 -1.442695, %v778_v14 }
 0xeea   :  { %1412 = vpow2.f32 %v1131_v16 }
 0xeeb   :  { %1414 = vtanh.f32 %v778_v14 }
 0xef4   :  { %v1413_v17 = vpop.eup %1412 }
 0xef5   :  { %v783_v18 = vadd.f32 1.0, %v1413_v17  ;;  %v1415_v7 = vpop.eup %1414 }
 0xef7   :  { %1416 = vrcp.f32 %v783_v18 }
 0xf01   :  { %v1417_v19 = vpop.eup %1416 }
 0xf02   :  { %v786_v20 = vsel %vm1556_vm4, %v1415_v7, %v1417_v19 }
 0xf03   :  { %789 = vrot.lane.b32.xlu0 %v786_v20, %s1463_s3  ;;  %v787_v0 = vmul.f32 %v786_v20, %v694_v63  ;;  %v1364_v63 = vpack.c.bf16 %v1013_v62, %v1012_v25 }
 0xf75   :  { %v790_v12 = vpop.permute.xlu0 %789 }
 0xf76   :  { %v792_v21 = vmul.f32 %v790_v12, %v786_v20 }
 0xf78   :  { %794 = vrot.lane.b32.xlu1 %v792_v21, %s1464_s13 }
 0xfea   :  { %v795_v22 = vpop.permute.xlu1 %794 }
 0xfeb   :  { %v797_v23 = vadd.f32 %v795_v22, %v787_v0 }
 0xfed   :  { %1418 = vtanh.f32 %v797_v23 }
 0xff7   :  { %v1419_v24 = vpop.eup %1418 }
 0xff8   :  { %800 = vrot.lane.b32.xlu0 %v1419_v24, %s1463_s3 }
0x106a   :  { %v801_v26 = vpop.permute.xlu0 %800 }
0x106b   :  { %v803_v27 = vmul.f32 %v801_v26, %v786_v20 }
0x106d   :  { %807 = vrot.lane.b32.xlu1 %v803_v27, %s1464_s13 }
0x10df   :  { %v808_v28 = vpop.permute.xlu1 %807 }
0x10e0   :  { %1284 = vmatmul.mubr.msk.f32.vlgmr.msra.gmra.mrb[12].mxu0 %vm189_vm5, %v808_v28 }
0x10e1   :  { %1305 = vmatprep.mubr.msk.f32.mxu0 %vm1461_vm1, %v1462_v10  ;;  %1362 = vmatpush3.bf16.msra.mxu0 %v1361_v61 }
0x10e2   :  { %1363 = vmatprep.subr.bf16.mxu0 %v1460_v3 }
0x10e5   :  { %1365 = vmatpush3.bf16.msra.mxu0 %v1364_v63 }
0x11b3   :  { %v877_v30 = vpop.f32.mrb[12].mxu0 }
0x11b4   :  { %v881_v31 = vadd.f32 %v877_v30, %v163_v29  ;;  %v1285_v32 = vpop.f32.mrb[13].mxu0 }
0x11b6   :  { %v1133_v33 = vmul.f32 -1.442695, %v881_v31 }
0x11b8   :  { %1420 = vpow2.f32 %v1133_v33 }
0x11b9   :  { %1422 = vtanh.f32 %v881_v31 }
0x11c2   :  { %v1421_v34 = vpop.eup %1420 }
0x11c3   :  { %v886_v35 = vadd.f32 1.0, %v1421_v34  ;;  %v1423_v36 = vpop.eup %1422 }
0x11c5   :  { %1424 = vrcp.f32 %v886_v35 }
0x11cf   :  { %v1425_v37 = vpop.eup %1424 }
0x11d0   :  { %v889_v38 = vsel %vm1556_vm4, %v1423_v36, %v1425_v37 }
0x11d1   :  { %892 = vrot.lane.b32.xlu0 %v889_v38, %s1463_s3  ;;  %v890_v4 = vmul.f32 %v889_v38, %v797_v23 }
0x1243   :  { %v893_v10 = vpop.permute.xlu0 %892 }
0x1244   :  { %v895_v39 = vmul.f32 %v893_v10, %v889_v38 }
0x1246   :  { %897 = vrot.lane.b32.xlu1 %v895_v39, %s1464_s13 }
0x12b8   :  { %v898_v40 = vpop.permute.xlu1 %897 }
0x12b9   :  { %v900_v41 = vadd.f32 %v898_v40, %v890_v4 }
0x12bb   :  { %1426 = vtanh.f32 %v900_v41 }
0x12c5   :  { %v1427_v42 = vpop.eup %1426 }
0x12c6   :  { %903 = vrot.lane.b32.xlu0 %v1427_v42, %s1463_s3 }
0x1338   :  { %v904_v43 = vpop.permute.xlu0 %903 }
0x1339   :  { %v906_v44 = vmul.f32 %v904_v43, %v889_v38 }
0x133b   :  { %910 = vrot.lane.b32.xlu1 %v906_v44, %s1464_s13 }
0x13ad   :  { %v911_v45 = vpop.permute.xlu1 %910 }
0x13ae   :  { %1295 = vmatmul.mubr.msk.f32.vlgmr.msra.gmra.mrb[8].mxu1 %vm189_vm5, %v911_v45 }
0x1481   :  { %v980_v47 = vpop.f32.mrb[8].mxu1 }
0x1482   :  { %v984_v48 = vadd.f32 %v980_v47, %v168_v46  ;;  %v1296_v49 = vpop.f32.mrb[9].mxu1 }
0x1484   :  { %v1135_v50 = vmul.f32 -1.442695, %v984_v48 }
0x1486   :  { %1428 = vpow2.f32 %v1135_v50 }
0x1487   :  { %1430 = vtanh.f32 %v984_v48 }
0x1490   :  { %v1429_v51 = vpop.eup %1428 }
0x1491   :  { %v989_v52 = vadd.f32 1.0, %v1429_v51  ;;  %v1431_v53 = vpop.eup %1430 }
0x1493   :  { %1432 = vrcp.f32 %v989_v52 }
0x149d   :  { %v1433_v54 = vpop.eup %1432 }
0x149e   :  { %v992_v55 = vsel %vm1556_vm4, %v1431_v53, %v1433_v54 }
0x149f   :  { %995 = vrot.lane.b32.xlu0 %v992_v55, %s1463_s3  ;;  %v993_v13 = vmul.f32 %v992_v55, %v900_v41 }
0x1511   :  { %v996_v56 = vpop.permute.xlu0 %995 }
0x1512   :  { %v998_v57 = vmul.f32 %v996_v56, %v992_v55 }
0x1514   :  { %1000 = vrot.lane.b32.xlu1 %v998_v57, %s1464_s13 }
0x1586   :  { %v1001_v2 = vpop.permute.xlu1 %1000 }
0x1587   :  { %v1003_v58 = vadd.f32 %v1001_v2, %v993_v13 }
0x1589   :  { %1434 = vtanh.f32 %v1003_v58 }
0x1593   :  { %v1435_v1 = vpop.eup %1434 }
0x1594   :  { %1006 = vrot.lane.b32.xlu0 %v1435_v1, %s1463_s3 }
0x1606   :  { %v1007_v5 = vpop.permute.xlu0 %1006 }
0x1607   :  { %v1009_v6 = vmul.f32 %v1007_v5, %v992_v55 }
0x1609   :  { %1022 = vrot.lane.b32.xlu1 %v1009_v6, %s1464_s13 }
0x167b   :  { %v1023_v8 = vpop.permute.xlu1 %1022 }
0x167c   :  { %1306 = vmatmul.mubr.msk.f32.vlgmr.msra.gmra.mrb[14].mxu0 %vm189_vm5, %v1023_v8 }
0x174f   :  { %v1092_v11 = vpop.f32.mrb[14].mxu0 }
0x1750   :  { %v1093_v3 = vadd.f32 %v1136_v9, %v1092_v11  ;;  %v1307_v14 = vpop.f32.mrb[15].mxu0 }
0x1752   :  { %1097 = vst.msk [vmem:[#allocation3] sm:$0xff] %vm1096_vm6, %v1093_v3 }
0x1753   :  { %1447 = shalt.err (!%p1444_p4)
}
0x1754   :  { %s1448_s3 = scalar_lea.hbm %s1726_s6, 128 }
0x1755   :  { %p1449_p5 = scmp.ne.s32.totalorder %s1726_s6, %s1448_s3  ;;  %p1452_p6 = scmp.lt.u32.totalorder %s1448_s3, %s1726_s6 }
0x1757   :  { %p1454_p7 = pnand %p1452_p6, %p1449_p5 }
0x1759   :  { %1457 = shalt.err (!%p1454_p7)
}
0x175a   :  { %1107 = dma.vmem_to_hbm [thread:$0]  %s1105_s10, 128, %s1726_s6, [#allocation4]  }
0x175b   :  { %1458 = dma.done.wait [#allocation4], 128  }
0x175c   :  { %1459 = vsyncadd [#allocation4], 4294967168 }
0x175d   :  { %1111 = vsyncpa [#allocation4], 1 }

</bundles_post_ra>
